<compile_context>
chip_gen: v6e
topology: v6e:2x2x1
jax: 0.10.0
libtpu: 0.0.40
codegen_flags: <defaults>
</compile_context>

<pallas_src>
import functools

import jax
import jax.numpy as jnp
from jax import lax
from jax.experimental import pallas as pl
from jax.experimental.pallas import tpu as pltpu


def _sincere_kernel(e_row_ref, e_allt_ref, lbl_col_ref, lbl_row_ref,
                    inv_cnt_row_ref, out_ref, *, inv_temp, softplus_bf16):
    """One row tile (Tr rows) of the SINCERE loss; writes a partial scalar."""
    tr = e_row_ref.shape[0]
    b = e_allt_ref.shape[1]

    # (Tr, D) x (D, B) on the MXU, f32 accumulation, canonical orientation (the
    # resident operand was pre-transposed once in the wrapper). 1/T is applied to
    # the f32 logits (one Tr*B VPU multiply) rather than to the (possibly bf16)
    # embeddings, for closer parity with the reference.
    logits = jnp.dot(e_row_ref[...], e_allt_ref[...],
                     preferred_element_type=jnp.float32) * jnp.float32(inv_temp)

    same_f = jnp.where(lbl_col_ref[...] == lbl_row_ref[...], 1.0, 0.0)   # (Tr,B)
    diff_f = 1.0 - same_f

    # Row-wise logsumexp over different-label columns, sharing the exponent with
    # the softplus below. m = max over ALL columns: always finite, keeps
    # exp(logits - m) <= 1, and is a valid (shift-invariant) logsumexp shift, so
    # there is no -inf / NaN anywhere in the kernel.
    m = jnp.max(logits, axis=1, keepdims=True)                # (Tr, 1)
    p = jnp.exp(logits - m)                                   # (Tr, B), in (0, 1]
    se = jnp.sum(p * diff_f, axis=1, keepdims=True)           # (Tr, 1); 0 iff no negatives
    has_neg_f = jnp.where(se > 0.0, 1.0, 0.0)                 # (Tr, 1)
    se_safe = jnp.maximum(se, jnp.float32(1e-30))             # keeps no-negative rows finite
    bd = m + jnp.log(se_safe)                                 # base_denom per row

    # ce = softplus(bd - logits) = log1p(exp(logits - bd)) + (bd - logits), with
    # exp(logits - bd) = p / se  (exponent reuse; per-row exact reciprocal).
    q = p * pl.reciprocal(se_safe)                            # (Tr, B)
    if softplus_bf16:
        # v6e / v7x only: run the softplus interior on the bf16 EUP path.
        log1p_q = jnp.log((1.0 + q).astype(jnp.bfloat16)).astype(jnp.float32)
    else:
        log1p_q = jnp.log(1.0 + q)
    ce = log1p_q + (bd - logits)                              # (Tr, B)

    # in_numer = same label minus the diagonal, straight from an iota equality
    # (no Tr x D diagonal recompute, no extra (Tr, D) temporaries).
    off = pl.program_id(0) * tr
    row_g = lax.broadcasted_iota(jnp.int32, (tr, b), 0)
    col_j = lax.broadcasted_iota(jnp.int32, (tr, b), 1)
    diag_f = jnp.where(col_j == row_g + off, 1.0, 0.0)
    numer_f = same_f - diag_f                                 # exactly 0/1

    # Multiply-masking; reduce rows first, then one multiply per column by 1/count.
    w = ce * (numer_f * has_neg_f)                            # (Tr, B)
    col_sum = jnp.sum(w, axis=0, keepdims=True)               # (1, B)
    partial = jnp.sum(col_sum * inv_cnt_row_ref[...])         # scalar f32

    # Lane-dense per-tile partial slab: value in lane 0, zeros elsewhere.
    lane = lax.broadcasted_iota(jnp.int32, (1, 128), 1)
    out_ref[...] = jnp.where(lane == 0, partial, jnp.float32(0.0))


def _device_kind():
    try:
        return jax.devices()[0].device_kind.lower()
    except Exception:
        return ""


def _vmem_capacity_bytes():
    try:
        info = pltpu.get_tpu_info()
        for attr in ("vmem_capacity_bytes", "vmem_size_bytes", "vmem_bytes"):
            v = getattr(info, attr, None)
            if v:
                return int(v)
    except Exception:
        pass
    return None


def _auto_row_tile(B, Dp, itemsize, budget_bytes, resident_bufs, max_tile):
    """VMEM-budget-driven row tile; prefers >=2 (and even) tile counts."""
    resident = resident_bufs * Dp * B * itemsize
    avail = budget_bytes - resident - 16 * B * 4
    pick = None
    for tr in (512, 256, 128, 64, 32, 16, 8):
        if tr > max_tile or B % tr != 0:
            continue
        # 2x(Tr,Dp) double-buffered row blocks + ~4 live (Tr,B) f32 temps + slack.
        need = 2 * tr * Dp * itemsize + 4 * tr * B * 4 + tr * Dp * 4
        if need <= avail:
            pick = tr
            break
    if pick is None:
        for tr in (8, 16, 32, 64, 128, 256, 512):
            if B % tr == 0:
                pick = tr
                break
    if pick is None:
        return B                                    # ragged batch: one full-row tile
    # keep >= 2 tiles (pipelining; v7x megacore sharding) ...
    while pick > 8 and (B // pick) < 2 and B % (pick // 2) == 0:
        pick //= 2
    # ... and prefer an even tile count so two TensorCores stay balanced.
    if (B // pick) > 1 and (B // pick) % 2 == 1 and pick >= 16 and B % (pick // 2) == 0:
        pick //= 2
    return pick


def sincere_loss(embeds, labels, temperature=0.07, row_tile=None,
                 single_buffer_resident=True, softplus_bf16=None):
    """Pallas SINCERE loss. embeds: (B, D) float32/bfloat16, labels: (B,) int.

    Returns a scalar float32 loss identical to the PyTorch SINCERELoss forward.
    """
    B, D = embeds.shape
    kind = _device_kind()

    # Pad the feature dim to a lane multiple (zero padding leaves dot products
    # unchanged); ragged last dims force masked loads / partial MXU feeds.
    Dp = D if D % 128 == 0 else ((D + 127) // 128) * 128
    e = embeds if Dp == D else jnp.pad(embeds, ((0, 0), (0, Dp - D)))
    e_t = e.T                                        # (Dp, B): one-time XLA transpose
    itemsize = int(jnp.dtype(e.dtype).itemsize)

    # Generation-aware VMEM limit: ~80% of physical capacity (≈51 MiB on v7x,
    # ≈102 MiB on v5e/v6e); conservative 48 MiB if the query is unavailable.
    cap = _vmem_capacity_bytes()
    if cap is None:
        vmem_limit = 48 * 1024 * 1024
        budget = 64 * 1024 * 1024
    else:
        vmem_limit = min(max(int(cap * 0.8), 32 * 1024 * 1024), 112 * 1024 * 1024)
        budget = vmem_limit

    is_old_gen = any(t in kind for t in ("v2", "v3", "v4", "v5"))
    max_tile = 256 if is_old_gen else 512            # v5e MXU is 4x128^2; v6e/v7x 256^2

    if row_tile is None:
        row_tile = _auto_row_tile(B, Dp, itemsize, budget,
                                  1 if single_buffer_resident else 2, max_tile)
    assert B % row_tile == 0, "row_tile must divide the batch"
    assert row_tile % 8 == 0 or row_tile == B, "row_tile must be a multiple of 8"
    nt = B // row_tile

    if softplus_bf16 is None:
        # bf16 EUP exists on v6e/v7x only; only worth it when inputs are already bf16.
        softplus_bf16 = (embeds.dtype == jnp.bfloat16
                         and any(t in kind for t in ("v6", "v7", "7x")))

    # Label metadata (cheap, O(B)): labels in both orientations + clamped per-column
    # reciprocal counts, so the kernel never relayouts or divides.
    labels = labels.astype(jnp.int32)
    labels_row = labels.reshape(1, B)
    labels_col = labels.reshape(B, 1)
    cnt = jnp.maximum(jnp.sum(labels_row == labels_col, axis=0) - 1, 1)
    inv_cnt_row = (1.0 / cnt.astype(jnp.float32)).reshape(1, B)

    def const_spec(shape):
        """BlockSpec for constant-block-index inputs: single-buffered if supported."""
        if single_buffer_resident and hasattr(pl, "Buffered"):
            try:
                return pl.BlockSpec(shape, lambda i: (0, 0),
                                    pipeline_mode=pl.Buffered(1))
            except Exception:
                pass
        return pl.BlockSpec(shape, lambda i: (0, 0))

    kernel = functools.partial(_sincere_kernel,
                               inv_temp=float(1.0 / temperature),
                               softplus_bf16=bool(softplus_bf16))
    cost = pl.CostEstimate(
        flops=int(2 * B * B * Dp),
        transcendentals=int(2 * B * B + 4 * B),
        bytes_accessed=int(2 * B * Dp * itemsize + 3 * B * 4 + nt * 128 * 4))

    partials = pl.pallas_call(
        kernel,
        out_shape=jax.ShapeDtypeStruct((1, nt * 128), jnp.float32),
        grid=(nt,),
        in_specs=[
            pl.BlockSpec((row_tile, Dp), lambda i: (i, 0)),   # row tile (double-buffered)
            const_spec((Dp, B)),                              # resident (D,B) operand
            pl.BlockSpec((row_tile, 1), lambda i: (i, 0)),    # labels, column orientation
            const_spec((1, B)),                               # labels, row orientation
            const_spec((1, B)),                               # 1 / positive count per column
        ],
        out_specs=pl.BlockSpec((1, 128), lambda i: (0, i)),
        compiler_params=pltpu.CompilerParams(
            dimension_semantics=("parallel",),
            vmem_limit_bytes=int(vmem_limit)),
        cost_estimate=cost,
    )(e, e_t, labels_col, labels_row, inv_cnt_row)

    return jnp.sum(partials) / jnp.float32(B)


def _sincere_loss_ref(embeds, labels, temperature=0.07):
    """Pure-JAX reference mirroring the PyTorch module (for verification)."""
    logits = jnp.dot(embeds, embeds.T, precision=lax.Precision.HIGHEST,
                     preferred_element_type=jnp.float32) / temperature
    logits = logits.astype(jnp.float32)
    B = logits.shape[0]
    same = labels[None, :] == labels[:, None]
    denom = jnp.where(~same, logits, -jnp.inf)
    base_denom = jax.nn.logsumexp(denom, axis=0)[:, None]
    in_numer = same & ~jnp.eye(B, dtype=bool)
    numer_count = jnp.maximum(jnp.sum(in_numer, axis=0), 1)
    numer_logits = jnp.where(in_numer, logits, 0.0)
    log_denom = jnp.where(in_numer, jnp.logaddexp(logits, base_denom), 0.0)
    ce = -(numer_logits - log_denom)
    return jnp.sum(ce / numer_count[None, :]) / B


if __name__ == "__main__":
    key = jax.random.PRNGKey(0)
    k_e, k_l = jax.random.split(key)

    B, D = 32, 32
    embeds = jax.random.normal(k_e, (B, D), dtype=jnp.float32)
    embeds = embeds / jnp.linalg.norm(embeds, axis=-1, keepdims=True)
    labels = jax.random.randint(k_l, (B,), 0, 4, dtype=jnp.int32)
    labels = labels.at[-1].set(17)   # guaranteed singleton class -> exercises clamp(min=1)

    def make_fn(single_buf):
        return jax.jit(
            functools.partial(sincere_loss, single_buffer_resident=single_buf),
            static_argnames=("temperature", "row_tile"))

    loss_fn = make_fn(True)
    try:
        loss = jax.block_until_ready(loss_fn(embeds, labels, temperature=0.07, row_tile=8))
    except Exception:
        # pl.Buffered(1) on constant-index inputs not supported on this JAX build:
        # fall back to default double buffering (correctness unaffected).
        loss_fn = make_fn(False)
        loss = jax.block_until_ready(loss_fn(embeds, labels, temperature=0.07, row_tile=8))

    ref = _sincere_loss_ref(embeds, labels, temperature=0.07)
    assert jnp.isfinite(loss), "loss is not finite"
    assert jnp.allclose(loss, ref, rtol=1e-4, atol=1e-4), (loss, ref)

    # Auto row-tile / generation-aware path (D padded 32 -> 128 in the wrapper).
    loss_auto = jax.block_until_ready(loss_fn(embeds, labels, temperature=0.07))
    assert jnp.allclose(loss_auto, ref, rtol=1e-4, atol=1e-4), (loss_auto, ref)

    # bf16 path (native MXU rate, f32 accumulation, bf16 softplus interior on v6e/v7x).
    e16 = embeds.astype(jnp.bfloat16)
    loss16 = jax.block_until_ready(loss_fn(e16, labels, temperature=0.07, row_tile=8))
    ref16 = _sincere_loss_ref(e16, labels, temperature=0.07)
    assert jnp.isfinite(loss16), "bf16 loss is not finite"
    assert jnp.allclose(loss16, ref16, rtol=5e-2, atol=1e-1), (loss16, ref16)

    # Degenerate case: whole batch one class -> no negatives -> loss == 0 (NaN-free path).
    labels_same = jnp.full((16,), 3, dtype=jnp.int32)
    loss0 = jax.block_until_ready(
        loss_fn(embeds[:16], labels_same, temperature=0.07, row_tile=8))
    ref0 = _sincere_loss_ref(embeds[:16], labels_same, temperature=0.07)
    assert jnp.allclose(loss0, 0.0, atol=1e-6), loss0
    assert jnp.allclose(ref0, 0.0, atol=1e-6), ref0

    print("KERNEL_OK")
</pallas_src>

<mosaic_0001>
module attributes {stable_mosaic.version = 11 : i64} {
  func.func @_sincere_kernel(%arg0: i32, %arg1: memref<8x128xf32, #tpu.memory_space<vmem>>, %arg2: memref<128x32xf32, #tpu.memory_space<vmem>>, %arg3: memref<8x1xi32, #tpu.memory_space<vmem>>, %arg4: memref<1x32xi32, #tpu.memory_space<vmem>>, %arg5: memref<1x32xf32, #tpu.memory_space<vmem>>, %arg6: memref<1x128xf32, #tpu.memory_space<vmem>>) attributes {dimension_semantics = [#tpu.dimension_semantics<parallel>], iteration_bounds = array<i64: 4>, scalar_prefetch = 0 : i64, scratch_operands = 0 : i64, tpu.core_type = #tpu.core_type<tc>, window_params = [{transform_indices = @transform_0, window_bounds = array<i64: 8, 128>}, {pipeline_mode = #tpu.pipeline_mode<synchronous>, transform_indices = @transform_1, window_bounds = array<i64: 128, 32>}, {transform_indices = @transform_2, window_bounds = array<i64: 8, 1>}, {pipeline_mode = #tpu.pipeline_mode<synchronous>, transform_indices = @transform_3, window_bounds = array<i64: 1, 32>}, {pipeline_mode = #tpu.pipeline_mode<synchronous>, transform_indices = @transform_4, window_bounds = array<i64: 1, 32>}, {transform_indices = @transform_5, window_bounds = array<i64: 1, 128>}]} {
    %c0 = arith.constant 0 : index
    %c0_0 = arith.constant 0 : index
    %0 = vector.load %arg1[%c0, %c0_0] : memref<8x128xf32, #tpu.memory_space<vmem>>, vector<8x128xf32>
    %c0_1 = arith.constant 0 : index
    %c0_2 = arith.constant 0 : index
    %1 = vector.load %arg2[%c0_1, %c0_2] : memref<128x32xf32, #tpu.memory_space<vmem>>, vector<128x32xf32>
    %cst = arith.constant dense<0.000000e+00> : vector<8x32xf32>
    %2 = tpu.matmul %0, %1, %cst {dimension_numbers = #tpu.dot_dimension_numbers<[1], [0], [0], [1], [0, 0, 1, 1], [], []>} : vector<8x128xf32>, vector<128x32xf32>, vector<8x32xf32> -> vector<8x32xf32>
    %cst_3 = arith.constant 14.2857141 : f32
    %3 = vector.broadcast %cst_3 : f32 to vector<8x32xf32>
    %4 = arith.mulf %2, %3 : vector<8x32xf32>
    %c0_4 = arith.constant 0 : index
    %c0_5 = arith.constant 0 : index
    %5 = vector.load %arg3[%c0_4, %c0_5] : memref<8x1xi32, #tpu.memory_space<vmem>>, vector<8x1xi32>
    %c0_6 = arith.constant 0 : index
    %c0_7 = arith.constant 0 : index
    %6 = vector.load %arg4[%c0_6, %c0_7] : memref<1x32xi32, #tpu.memory_space<vmem>>, vector<1x32xi32>
    %7 = vector.broadcast %5 : vector<8x1xi32> to vector<8x32xi32>
    %8 = vector.broadcast %6 : vector<1x32xi32> to vector<8x32xi32>
    %9 = arith.cmpi eq, %7, %8 : vector<8x32xi32>
    %cst_8 = arith.constant 1.000000e+00 : f32
    %cst_9 = arith.constant 0.000000e+00 : f32
    %10 = vector.broadcast %cst_8 : f32 to vector<8x32xf32>
    %11 = vector.broadcast %cst_9 : f32 to vector<8x32xf32>
    %12 = arith.select %9, %10, %11 : vector<8x32xi1>, vector<8x32xf32>
    %cst_10 = arith.constant 1.000000e+00 : f32
    %13 = vector.broadcast %cst_10 : f32 to vector<8x32xf32>
    %14 = arith.subf %13, %12 : vector<8x32xf32>
    %cst_11 = arith.constant dense<0xFF800000> : vector<8xf32>
    %15 = vector.multi_reduction <maximumf>, %4, %cst_11 [1] : vector<8x32xf32> to vector<8xf32>
    %16 = vector.shape_cast %15 : vector<8xf32> to vector<8x1xf32>
    %17 = vector.broadcast %16 : vector<8x1xf32> to vector<8x32xf32>
    %18 = arith.subf %4, %17 : vector<8x32xf32>
    %19 = math.exp %18 : vector<8x32xf32>
    %20 = arith.mulf %19, %14 : vector<8x32xf32>
    %cst_12 = arith.constant dense<0.000000e+00> : vector<8xf32>
    %21 = vector.multi_reduction <add>, %20, %cst_12 [1] : vector<8x32xf32> to vector<8xf32>
    %22 = vector.shape_cast %21 : vector<8xf32> to vector<8x1xf32>
    %cst_13 = arith.constant 0.000000e+00 : f32
    %23 = vector.broadcast %cst_13 : f32 to vector<8x1xf32>
    %24 = arith.cmpf ogt, %22, %23 : vector<8x1xf32>
    %cst_14 = arith.constant 1.000000e+00 : f32
    %cst_15 = arith.constant 0.000000e+00 : f32
    %25 = vector.broadcast %cst_14 : f32 to vector<8x1xf32>
    %26 = vector.broadcast %cst_15 : f32 to vector<8x1xf32>
    %27 = arith.select %24, %25, %26 : vector<8x1xi1>, vector<8x1xf32>
    %cst_16 = arith.constant 1.000000e-30 : f32
    %28 = vector.broadcast %cst_16 : f32 to vector<8x1xf32>
    %29 = arith.maximumf %22, %28 : vector<8x1xf32>
    %30 = math.log %29 : vector<8x1xf32>
    %31 = arith.addf %16, %30 : vector<8x1xf32>
    %32 = tpu.reciprocal %29 : vector<8x1xf32> -> vector<8x1xf32>
    %33 = vector.broadcast %32 : vector<8x1xf32> to vector<8x32xf32>
    %34 = arith.mulf %19, %33 : vector<8x32xf32>
    %cst_17 = arith.constant 1.000000e+00 : f32
    %35 = vector.broadcast %cst_17 : f32 to vector<8x32xf32>
    %36 = arith.addf %35, %34 : vector<8x32xf32>
    %37 = math.log %36 : vector<8x32xf32>
    %38 = vector.broadcast %31 : vector<8x1xf32> to vector<8x32xf32>
    %39 = arith.subf %38, %4 : vector<8x32xf32>
    %40 = arith.addf %37, %39 : vector<8x32xf32>
    %c8_i32 = arith.constant 8 : i32
    %41 = arith.muli %arg0, %c8_i32 : i32
    %42 = tpu.iota {dimensions = array<i32: 0>} : vector<8x32xi32>
    %43 = tpu.iota {dimensions = array<i32: 1>} : vector<8x32xi32>
    %44 = vector.broadcast %41 : i32 to vector<8x32xi32>
    %45 = arith.addi %42, %44 : vector<8x32xi32>
    %46 = arith.cmpi eq, %43, %45 : vector<8x32xi32>
    %cst_18 = arith.constant 1.000000e+00 : f32
    %cst_19 = arith.constant 0.000000e+00 : f32
    %47 = vector.broadcast %cst_18 : f32 to vector<8x32xf32>
    %48 = vector.broadcast %cst_19 : f32 to vector<8x32xf32>
    %49 = arith.select %46, %47, %48 : vector<8x32xi1>, vector<8x32xf32>
    %50 = arith.subf %12, %49 : vector<8x32xf32>
    %51 = vector.broadcast %27 : vector<8x1xf32> to vector<8x32xf32>
    %52 = arith.mulf %50, %51 : vector<8x32xf32>
    %53 = arith.mulf %40, %52 : vector<8x32xf32>
    %cst_20 = arith.constant dense<0.000000e+00> : vector<32xf32>
    %54 = vector.multi_reduction <add>, %53, %cst_20 [0] : vector<8x32xf32> to vector<32xf32>
    %55 = vector.shape_cast %54 : vector<32xf32> to vector<1x32xf32>
    %c0_21 = arith.constant 0 : index
    %c0_22 = arith.constant 0 : index
    %56 = vector.load %arg5[%c0_21, %c0_22] : memref<1x32xf32, #tpu.memory_space<vmem>>, vector<1x32xf32>
    %57 = arith.mulf %55, %56 : vector<1x32xf32>
    %58 = vector.shape_cast %57 : vector<1x32xf32> to vector<1x1x32xf32>
    %cst_23 = arith.constant dense<0.000000e+00> : vector<1xf32>
    %59 = vector.multi_reduction <add>, %58, %cst_23 [1, 2] : vector<1x1x32xf32> to vector<1xf32>
    %60 = vector.shape_cast %59 : vector<1xf32> to vector<1x1x1xf32>
    %61 = vector.extract %60[0, 0, 0] : f32 from vector<1x1x1xf32>
    %62 = tpu.iota {dimensions = array<i32: 1>} : vector<1x128xi32>
    %c0_i32 = arith.constant 0 : i32
    %63 = vector.broadcast %c0_i32 : i32 to vector<1x128xi32>
    %64 = arith.cmpi eq, %62, %63 : vector<1x128xi32>
    %cst_24 = arith.constant 0.000000e+00 : f32
    %65 = vector.broadcast %61 : f32 to vector<1x128xf32>
    %66 = vector.broadcast %cst_24 : f32 to vector<1x128xf32>
    %67 = arith.select %64, %65, %66 : vector<1x128xi1>, vector<1x128xf32>
    %c0_25 = arith.constant 0 : index
    %c0_26 = arith.constant 0 : index
    %68 = vector.load %arg6[%c0_25, %c0_26] : memref<1x128xf32, #tpu.memory_space<vmem>>, vector<1x128xf32>
    tpu.vector_store %arg6[%c0_25, %c0_26], %67 {strides = array<i32>} : memref<1x128xf32, #tpu.memory_space<vmem>>, vector<1x128xf32>,
    return
  }
  func.func @transform_0(%arg0: i32) -> (i32, i32) {
    %c0_i32 = arith.constant 0 : i32
    %c0_i32_0 = arith.constant 0 : i32
    return %arg0, %c0_i32 : i32, i32
  }
  func.func @transform_1(%arg0: i32) -> (i32, i32) {
    %c0_i32 = arith.constant 0 : i32
    %c0_i32_0 = arith.constant 0 : i32
    %c0_i32_1 = arith.constant 0 : i32
    return %c0_i32, %c0_i32_0 : i32, i32
  }
  func.func @transform_2(%arg0: i32) -> (i32, i32) {
    %c0_i32 = arith.constant 0 : i32
    %c0_i32_0 = arith.constant 0 : i32
    return %arg0, %c0_i32 : i32, i32
  }
  func.func @transform_3(%arg0: i32) -> (i32, i32) {
    %c0_i32 = arith.constant 0 : i32
    %c0_i32_0 = arith.constant 0 : i32
    %c0_i32_1 = arith.constant 0 : i32
    return %c0_i32, %c0_i32_0 : i32, i32
  }
  func.func @transform_4(%arg0: i32) -> (i32, i32) {
    %c0_i32 = arith.constant 0 : i32
    %c0_i32_0 = arith.constant 0 : i32
    %c0_i32_1 = arith.constant 0 : i32
    return %c0_i32, %c0_i32_0 : i32, i32
  }
  func.func @transform_5(%arg0: i32) -> (i32, i32) {
    %c0_i32 = arith.constant 0 : i32
    %c0_i32_0 = arith.constant 0 : i32
    return %c0_i32, %arg0 : i32, i32
  }
}

module attributes {stable_mosaic.version = 11 : i64} {
  func.func @_sincere_kernel(%arg0: i32, %arg1: memref<8x128xf32, #tpu.memory_space<vmem>>, %arg2: memref<128x32xf32, #tpu.memory_space<vmem>>, %arg3: memref<8x1xi32, #tpu.memory_space<vmem>>, %arg4: memref<1x32xi32, #tpu.memory_space<vmem>>, %arg5: memref<1x32xf32, #tpu.memory_space<vmem>>, %arg6: memref<1x128xf32, #tpu.memory_space<vmem>>) attributes {dimension_semantics = [#tpu.dimension_semantics<parallel>], iteration_bounds = array<i64: 4>, scalar_prefetch = 0 : i64, scratch_operands = 0 : i64, tpu.core_type = #tpu.core_type<tc>, window_params = [{transform_indices = @transform_0, window_bounds = array<i64: 8, 128>}, {pipeline_mode = #tpu.pipeline_mode<synchronous>, transform_indices = @transform_1, window_bounds = array<i64: 128, 32>}, {transform_indices = @transform_2, window_bounds = array<i64: 8, 1>}, {pipeline_mode = #tpu.pipeline_mode<synchronous>, transform_indices = @transform_3, window_bounds = array<i64: 1, 32>}, {pipeline_mode = #tpu.pipeline_mode<synchronous>, transform_indices = @transform_4, window_bounds = array<i64: 1, 32>}, {transform_indices = @transform_5, window_bounds = array<i64: 1, 128>}]} {
    %c0 = arith.constant 0 : index
    %c0_0 = arith.constant 0 : index
    %0 = vector.load %arg1[%c0, %c0_0] : memref<8x128xf32, #tpu.memory_space<vmem>>, vector<8x128xf32>
    %c0_1 = arith.constant 0 : index
    %c0_2 = arith.constant 0 : index
    %1 = vector.load %arg2[%c0_1, %c0_2] : memref<128x32xf32, #tpu.memory_space<vmem>>, vector<128x32xf32>
    %cst = arith.constant dense<0.000000e+00> : vector<8x32xf32>
    %2 = tpu.matmul %0, %1, %cst {dimension_numbers = #tpu.dot_dimension_numbers<[1], [0], [0], [1], [0, 0, 1, 1], [], []>} : vector<8x128xf32>, vector<128x32xf32>, vector<8x32xf32> -> vector<8x32xf32>
    %cst_3 = arith.constant 14.2857141 : f32
    %3 = vector.broadcast %cst_3 : f32 to vector<8x32xf32>
    %4 = arith.mulf %2, %3 : vector<8x32xf32>
    %c0_4 = arith.constant 0 : index
    %c0_5 = arith.constant 0 : index
    %5 = vector.load %arg3[%c0_4, %c0_5] : memref<8x1xi32, #tpu.memory_space<vmem>>, vector<8x1xi32>
    %c0_6 = arith.constant 0 : index
    %c0_7 = arith.constant 0 : index
    %6 = vector.load %arg4[%c0_6, %c0_7] : memref<1x32xi32, #tpu.memory_space<vmem>>, vector<1x32xi32>
    %7 = vector.broadcast %5 : vector<8x1xi32> to vector<8x32xi32>
    %8 = vector.broadcast %6 : vector<1x32xi32> to vector<8x32xi32>
    %9 = arith.cmpi eq, %7, %8 : vector<8x32xi32>
    %cst_8 = arith.constant 1.000000e+00 : f32
    %cst_9 = arith.constant 0.000000e+00 : f32
    %10 = vector.broadcast %cst_8 : f32 to vector<8x32xf32>
    %11 = vector.broadcast %cst_9 : f32 to vector<8x32xf32>
    %12 = arith.select %9, %10, %11 : vector<8x32xi1>, vector<8x32xf32>
    %cst_10 = arith.constant 1.000000e+00 : f32
    %13 = vector.broadcast %cst_10 : f32 to vector<8x32xf32>
    %14 = arith.subf %13, %12 : vector<8x32xf32>
    %cst_11 = arith.constant dense<0xFF800000> : vector<8xf32>
    %15 = vector.multi_reduction <maximumf>, %4, %cst_11 [1] : vector<8x32xf32> to vector<8xf32>
    %16 = vector.shape_cast %15 : vector<8xf32> to vector<8x1xf32>
    %17 = vector.broadcast %16 : vector<8x1xf32> to vector<8x32xf32>
    %18 = arith.subf %4, %17 : vector<8x32xf32>
    %19 = math.exp %18 : vector<8x32xf32>
    %20 = arith.mulf %19, %14 : vector<8x32xf32>
    %cst_12 = arith.constant dense<0.000000e+00> : vector<8xf32>
    %21 = vector.multi_reduction <add>, %20, %cst_12 [1] : vector<8x32xf32> to vector<8xf32>
    %22 = vector.shape_cast %21 : vector<8xf32> to vector<8x1xf32>
    %cst_13 = arith.constant 0.000000e+00 : f32
    %23 = vector.broadcast %cst_13 : f32 to vector<8x1xf32>
    %24 = arith.cmpf ogt, %22, %23 : vector<8x1xf32>
    %cst_14 = arith.constant 1.000000e+00 : f32
    %cst_15 = arith.constant 0.000000e+00 : f32
    %25 = vector.broadcast %cst_14 : f32 to vector<8x1xf32>
    %26 = vector.broadcast %cst_15 : f32 to vector<8x1xf32>
    %27 = arith.select %24, %25, %26 : vector<8x1xi1>, vector<8x1xf32>
    %cst_16 = arith.constant 1.000000e-30 : f32
    %28 = vector.broadcast %cst_16 : f32 to vector<8x1xf32>
    %29 = arith.maximumf %22, %28 : vector<8x1xf32>
    %30 = math.log %29 : vector<8x1xf32>
    %31 = arith.addf %16, %30 : vector<8x1xf32>
    %32 = tpu.reciprocal %29 : vector<8x1xf32> -> vector<8x1xf32>
    %33 = vector.broadcast %32 : vector<8x1xf32> to vector<8x32xf32>
    %34 = arith.mulf %19, %33 : vector<8x32xf32>
    %cst_17 = arith.constant 1.000000e+00 : f32
    %35 = vector.broadcast %cst_17 : f32 to vector<8x32xf32>
    %36 = arith.addf %35, %34 : vector<8x32xf32>
    %37 = math.log %36 : vector<8x32xf32>
    %38 = vector.broadcast %31 : vector<8x1xf32> to vector<8x32xf32>
    %39 = arith.subf %38, %4 : vector<8x32xf32>
    %40 = arith.addf %37, %39 : vector<8x32xf32>
    %c8_i32 = arith.constant 8 : i32
    %41 = arith.muli %arg0, %c8_i32 : i32
    %42 = tpu.iota {dimensions = array<i32: 0>} : vector<8x32xi32>
    %43 = tpu.iota {dimensions = array<i32: 1>} : vector<8x32xi32>
    %44 = vector.broadcast %41 : i32 to vector<8x32xi32>
    %45 = arith.addi %42, %44 : vector<8x32xi32>
    %46 = arith.cmpi eq, %43, %45 : vector<8x32xi32>
    %cst_18 = arith.constant 1.000000e+00 : f32
    %cst_19 = arith.constant 0.000000e+00 : f32
    %47 = vector.broadcast %cst_18 : f32 to vector<8x32xf32>
    %48 = vector.broadcast %cst_19 : f32 to vector<8x32xf32>
    %49 = arith.select %46, %47, %48 : vector<8x32xi1>, vector<8x32xf32>
    %50 = arith.subf %12, %49 : vector<8x32xf32>
    %51 = vector.broadcast %27 : vector<8x1xf32> to vector<8x32xf32>
    %52 = arith.mulf %50, %51 : vector<8x32xf32>
    %53 = arith.mulf %40, %52 : vector<8x32xf32>
    %cst_20 = arith.constant dense<0.000000e+00> : vector<32xf32>
    %54 = vector.multi_reduction <add>, %53, %cst_20 [0] : vector<8x32xf32> to vector<32xf32>
    %55 = vector.shape_cast %54 : vector<32xf32> to vector<1x32xf32>
    %c0_21 = arith.constant 0 : index
    %c0_22 = arith.constant 0 : index
    %56 = vector.load %arg5[%c0_21, %c0_22] : memref<1x32xf32, #tpu.memory_space<vmem>>, vector<1x32xf32>
    %57 = arith.mulf %55, %56 : vector<1x32xf32>
    %58 = vector.shape_cast %57 : vector<1x32xf32> to vector<1x1x32xf32>
    %cst_23 = arith.constant dense<0.000000e+00> : vector<1xf32>
    %59 = vector.multi_reduction <add>, %58, %cst_23 [1, 2] : vector<1x1x32xf32> to vector<1xf32>
    %60 = vector.shape_cast %59 : vector<1xf32> to vector<1x1x1xf32>
    %61 = vector.extract %60[0, 0, 0] : f32 from vector<1x1x1xf32>
    %62 = tpu.iota {dimensions = array<i32: 1>} : vector<1x128xi32>
    %c0_i32 = arith.constant 0 : i32
    %63 = vector.broadcast %c0_i32 : i32 to vector<1x128xi32>
    %64 = arith.cmpi eq, %62, %63 : vector<1x128xi32>
    %cst_24 = arith.constant 0.000000e+00 : f32
    %65 = vector.broadcast %61 : f32 to vector<1x128xf32>
    %66 = vector.broadcast %cst_24 : f32 to vector<1x128xf32>
    %67 = arith.select %64, %65, %66 : vector<1x128xi1>, vector<1x128xf32>
    %c0_25 = arith.constant 0 : index
    %c0_26 = arith.constant 0 : index
    %68 = vector.load %arg6[%c0_25, %c0_26] : memref<1x128xf32, #tpu.memory_space<vmem>>, vector<1x128xf32>
    tpu.vector_store %arg6[%c0_25, %c0_26], %67 {strides = array<i32>} : memref<1x128xf32, #tpu.memory_space<vmem>>, vector<1x128xf32>,
    return
  }
  func.func @transform_0(%arg0: i32) -> (i32, i32) {
    %c0_i32 = arith.constant 0 : i32
    %c0_i32_0 = arith.constant 0 : i32
    return %arg0, %c0_i32 : i32, i32
  }
  func.func @transform_1(%arg0: i32) -> (i32, i32) {
    %c0_i32 = arith.constant 0 : i32
    %c0_i32_0 = arith.constant 0 : i32
    %c0_i32_1 = arith.constant 0 : i32
    return %c0_i32, %c0_i32_0 : i32, i32
  }
  func.func @transform_2(%arg0: i32) -> (i32, i32) {
    %c0_i32 = arith.constant 0 : i32
    %c0_i32_0 = arith.constant 0 : i32
    return %arg0, %c0_i32 : i32, i32
  }
  func.func @transform_3(%arg0: i32) -> (i32, i32) {
    %c0_i32 = arith.constant 0 : i32
    %c0_i32_0 = arith.constant 0 : i32
    %c0_i32_1 = arith.constant 0 : i32
    return %c0_i32, %c0_i32_0 : i32, i32
  }
  func.func @transform_4(%arg0: i32) -> (i32, i32) {
    %c0_i32 = arith.constant 0 : i32
    %c0_i32_0 = arith.constant 0 : i32
    %c0_i32_1 = arith.constant 0 : i32
    return %c0_i32, %c0_i32_0 : i32, i32
  }
  func.func @transform_5(%arg0: i32) -> (i32, i32) {
    %c0_i32 = arith.constant 0 : i32
    %c0_i32_0 = arith.constant 0 : i32
    return %c0_i32, %arg0 : i32, i32
  }
}

</mosaic_0001>

<bundles_post_ra>
// kernel: sincere_loss.1
= control target key start
LH: loop header
LB: loop body
LE: loop exit
PB: predicated region body
PF: predicated region fallthrough
CT: control target
= control target key end

     0   :  { %s580_s18 = smov 0   ;;  %s686_s0 = inlined_call_operand.vmem [shape: f32[32,128], index: 0, kind: input, shape index: {}]   ;;  %s687_s1 = inlined_call_operand.vmem [shape: f32[128,32], index: 1, kind: input, shape index: {}]   ;;  %s688_s2 = inlined_call_operand.vmem [shape: s32[32,1], index: 2, kind: input, shape index: {}]   ;;  %s689_s3 = inlined_call_operand.vmem [shape: s32[1,32], index: 3, kind: input, shape index: {}]   ;;  %s690_s4 = inlined_call_operand.vmem [shape: f32[1,32], index: 4, kind: input, shape index: {}]   ;;  %s691_s5 = inlined_call_operand.vmem [shape: f32[1,512], index: 5, kind: output, shape index: {}]  }
   0x1 LB: > { %s586_s19 = sadd.s32 4294967295, %s545_s18   ;;  %p458_p0 = scmp.ge.s32.totalorder %s545_s18, 1  ;;  %s545_s18 = sphi %s580_s18, %s15_s18  }
   0x2   : > { %p195_p1 = scmp.lt.s32.totalorder %s545_s18, 5 }
   0x4   : > { %p196_p2 = pnand %p458_p0, %p195_p1 }
   0x5   : > { %p224_p3 = scmp.lt.s32.totalorder (!%p196_p2), %s586_s19, 3  ;;  %s462_s14 = sshll.u32 (!%p196_p2), %s586_s19, 3 }
   0x6   : > { %199 = sbr.rel (%p196_p2) target bundleno = 796 (0x31c), region = 40 }
   0xb   : > { %v251_v0 = vld [vmem:[%s687_s1 + $0x78] sm:$0xff]  ;;  %v547_v1 = vmov 0.0   ;;  %v250_v2 = vld [vmem:[%s687_s1 + $0x70] sm:$0xff]  ;;  %vm548_vm0 = vmmov 0   ;;  %v249_v3 = vld [vmem:[%s687_s1 + $0x68] sm:$0xff]  ;;  %s636_s17 = scalar_select %p224_p3, %s586_s19, 3  ;;  %v360_v37 = vlaneseq  ;;  %v364_v41 = vstv %s462_s14 }
   0xc   : > { %482 = vmatprep.subr.mxu0 %v547_v1  ;;  %514 = vmatprep.mubr.msk.f32.mxu0 %vm548_vm0, %v547_v1  ;;  %v248_v4 = vld [vmem:[%s687_s1 + $0x60] sm:$0xff]  ;;  %v247_v5 = vld [vmem:[%s687_s1 + $0x58] sm:$0xff]  ;;  %v246_v6 = vld [vmem:[%s687_s1 + $0x50] sm:$0xff]  ;;  %v549_v18 = vmov 0   ;;  %vm335_vm1 = vcmask 261120   ;;  %vm380_vm5 = vcmask 253952  }
   0xd   : > { %483 = vmatpush3.msra.mxu0 %v251_v0  ;;  %v245_v7 = vld [vmem:[%s687_s1 + $0x48] sm:$0xff]  ;;  %v244_v8 = vld [vmem:[%s687_s1 + $0x40] sm:$0xff]  ;;  %v243_v9 = vld [vmem:[%s687_s1 + $0x38] sm:$0xff]  ;;  %s459_s24 = sshll.u32 %s636_s17, 3  ;;  %530 = vset.pattern.permute.xlu0 %v549_v18  ;;  %v361_v40 = vshrl.u32 %v360_v37, 7  ;;  %v363_v43 = vand.u32 127, %v360_v37  ;;  %s234_s21 = scalar_lea.vmem %s691_s5, %s636_s17 }
   0xe   : > { %484 = vmatprep.subr.mxu0 %v547_v1  ;;  %v242_v10 = vld [vmem:[%s687_s1 + $0x30] sm:$0xff]  ;;  %v241_v11 = vld [vmem:[%s687_s1 + $0x28] sm:$0xff]  ;;  %v240_v12 = vld [vmem:[%s687_s1 + $0x20] sm:$0xff]  ;;  %s227_s6 = scalar_lea.vmem %s686_s0, %s459_s24  ;;  %s231_s11 = scalar_lea.vmem %s688_s2, %s459_s24 }
   0xf   : > { %485 = vmatpush3.msra.mxu0 %v250_v2  ;;  %v239_v13 = vld [vmem:[%s687_s1 + $0x18] sm:$0xff]  ;;  %v238_v14 = vld [vmem:[%s687_s1 + $0x10] sm:$0xff]  ;;  %v237_v15 = vld [vmem:[%s687_s1 + $0x8] sm:$0xff]  ;;  %v365_v44 = vadd.s32 %v364_v41, %v361_v40  ;;  %vm391_vm6 = vcmp.eq.s32.totalorder %v363_v43, 0 }
  0x10   : > { %486 = vmatprep.subr.mxu0 %v547_v1  ;;  %v236_v16 = vld [vmem:[%s687_s1] sm:$0xff] }
  0x11   : > { %487 = vmatpush3.msra.mxu0 %v249_v3  ;;  %v235_v17 = vld [vmem:[%s227_s6] sm:$0xff]  ;;  %vm366_vm3 = vcmp.eq.s32.totalorder %v363_v43, %v365_v44 }
  0x12   : > { %488 = vmatprep.subr.mxu0 %v547_v1  ;;  %v323_v23 = vld [vmem:[%s231_s11] sm:$0xff]  ;;  %v367_v47 = vsel %vm366_vm3, 1.0, %v547_v1 }
  0x13   : > { %489 = vmatpush3.msra.mxu0 %v248_v4  ;;  %v461_v27 = vld [vmem:[%s689_s3] ss:$0 sm:$0xff] }
  0x14   : > { %490 = vmatprep.subr.mxu0 %v547_v1  ;;  %v378_v62 = vld [vmem:[%s690_s4] sm:$0x1] }
  0x15   : > { %491 = vmatpush3.msra.mxu0 %v247_v5 }
  0x16   : > { %492 = vmatprep.subr.mxu0 %v547_v1 }
  0x17   : > { %493 = vmatpush3.msra.mxu0 %v246_v6 }
  0x18   : > { %494 = vmatprep.subr.mxu0 %v547_v1 }
  0x19   : > { %495 = vmatpush3.msra.mxu0 %v245_v7 }
  0x1a   : > { %496 = vmatprep.subr.mxu0 %v547_v1 }
  0x1b   : > { %497 = vmatpush3.msra.mxu0 %v244_v8 }
  0x1c   : > { %498 = vmatprep.subr.mxu0 %v547_v1 }
  0x1d   : > { %499 = vmatpush3.msra.mxu0 %v243_v9 }
  0x1e   : > { %500 = vmatprep.subr.mxu0 %v547_v1 }
  0x1f   : > { %501 = vmatpush3.msra.mxu0 %v242_v10 }
  0x20   : > { %502 = vmatprep.subr.mxu0 %v547_v1 }
  0x21   : > { %503 = vmatpush3.msra.mxu0 %v241_v11 }
  0x22   : > { %504 = vmatprep.subr.mxu0 %v547_v1 }
  0x23   : > { %505 = vmatpush3.msra.mxu0 %v240_v12 }
  0x24   : > { %506 = vmatprep.subr.mxu0 %v547_v1 }
  0x25   : > { %507 = vmatpush3.msra.mxu0 %v239_v13 }
  0x26   : > { %508 = vmatprep.subr.mxu0 %v547_v1 }
  0x27   : > { %509 = vmatpush3.msra.mxu0 %v238_v14 }
  0x28   : > { %510 = vmatprep.subr.mxu0 %v547_v1 }
  0x29   : > { %511 = vmatpush3.msra.mxu0 %v237_v15 }
  0x2a   : > { %512 = vmatprep.subr.mxu0 %v547_v1 }
  0x2b   : > { %513 = vmatpush3.msra.mxu0 %v236_v16 }
  0x2c   : > { %515 = vmatmul.mubr.f32.vlgmr.msra.gmra.mxu0 %v235_v17 }
  0xec   : > { %v318_v19 = vpop.f32.mrf.mxu0 }
  0xed   : > { %v322_v20 = vmul.f32 14.285714, %v318_v19 }
  0xee   : > { %v516_v21 = vpop.f32.mrf.mxu0 }
  0xef   : > { %v336_v22 = vsel %vm335_vm1, %v322_v20, -inf }
  0xf0   : > { %337 = vmax.xlane.f32.xlu0 %v336_v22 }
 0x106   : > { %326 = vperm.xlu0 %530, %v323_v23  }
 0x179   : > { %v338_v24 = vpop.xlane.xlu0 %337 }
 0x17a   : > { %v339_v25 = vsub.f32 %v322_v20, %v338_v24 }
 0x17c   : > { %v340_v26 = vmul.f32 1.442695, %v339_v25 }
 0x17e   : > { %531 = vpow2.f32 %v340_v26 }
 0x181   : > { %v327_v28 = vpop.permute.xlu0 %326 }
 0x182   : > { %vm332_vm2 = vcmp.eq.s32.totalorder %v327_v28, %v461_v27 }
 0x183   : > { %v333_v29 = vsel %vm332_vm2, 1.0, %v547_v1 }
 0x184   : > { %v334_v30 = vsub.f32 1.0, %v333_v29  ;;  %v368_v50 = vsub.f32 %v333_v29, %v367_v47 }
 0x18b   : > { %v532_v31 = vpop.eup %531 }
 0x18c   : > { %v342_v32 = vmul.f32 %v532_v31, %v334_v30 }
 0x18e   : > { %v343_v33 = vsel %vm335_vm1, %v342_v32, 0.0 }
 0x18f   : > { %344 = vadd.xlane.f32.xlu1 %v343_v33 }
 0x218   : > { %v345_v34 = vpop.xlane.xlu1 %344 }
 0x219   : > { %v348_v35 = vmax.f32 %v345_v34, 1e-30  ;;  %vm346_vm4 = vcmp.gt.f32.partialorder %v345_v34, 0.0 }
 0x21a   : > { %v347_v49 = vsel %vm346_vm4, 1.0, %v547_v1 }
 0x21b   : > { %533 = vrcp.f32 %v348_v35  ;;  %v369_v54 = vmul.f32 %v368_v50, %v347_v49 }
 0x21c   : > { %535 = vlog2.f32 %v348_v35 }
 0x228   : > { %v534_v36 = vpop.eup %533 }
 0x229   : > { %v353_v38 = vmul.f32 %v534_v36, %v532_v31  ;;  %v536_v42 = vpop.eup %535 }
 0x22a   : > { %v350_v45 = vmul.f32 0.6931472, %v536_v42 }
 0x22b   : > { %v354_v39 = vadd.f32 1.0, %v353_v38 }
 0x22c   : > { %v351_v46 = vadd.f32 %v350_v45, %v338_v24 }
 0x22d   : > { %537 = vlog2.f32 %v354_v39 }
 0x22e   : > { %v357_v52 = vsub.f32 %v351_v46, %v322_v20 }
 0x23a   : > { %v538_v48 = vpop.eup %537 }
 0x23b   : > { %v356_v51 = vmul.f32 0.6931472, %v538_v48 }
 0x23d   : > { %v358_v53 = vadd.f32 %v357_v52, %v356_v51 }
 0x23f   : > { %v370_v55 = vmul.f32 %v369_v54, %v358_v53 }
 0x241   : > { %v371_v56 = vsel %vm335_vm1, %v370_v55, 0.0 }
 0x242   : > { %v372_v57 = vrot.slane %v371_v56, 4 }
 0x244   : > { %v373_v58 = vadd.f32 %v372_v57, %v371_v56 }
 0x246   : > { %v374_v59 = vrot.slane %v373_v58, 2 }
 0x248   : > { %v375_v60 = vadd.f32 %v374_v59, %v373_v58 }
 0x24a   : > { %v376_v61 = vrot.slane %v375_v60, 1 }
 0x24c   : > { %v377_v63 = vadd.f32 %v376_v61, %v375_v60 }
 0x24e   : > { %v379_v0 = vmul.f32 %v378_v62, %v377_v63 }
 0x250   : > { %v381_v1 = vsel %vm380_vm5, %v379_v0, 0.0 }
 0x251   : > { %382 = vadd.xlane.f32.xlu1 %v381_v1 }
 0x2da   : > { %v383_v2 = vpop.xlane.xlu1 %382 }
 0x2db   : > { %v384_v3 = vrot.slane %v383_v2, 4 }
 0x2dd   : > { %v385_v4 = vadd.f32 %v384_v3, %v383_v2 }
 0x2df   : > { %v386_v5 = vrot.slane %v385_v4, 2 }
 0x2e1   : > { %v387_v6 = vadd.f32 %v386_v5, %v385_v4 }
 0x2e3   : > { %v388_v7 = vrot.slane %v387_v6, 1 }
 0x2e5   : > { %v389_v8 = vadd.f32 %v388_v7, %v387_v6 }
 0x2e7   : > { %517 = vpush %v389_v8 }
 0x318   : > { %s518_s22 = spop %517 }
 0x319   : > { %v392_v9 = vstv %s518_s22 }
 0x31a   : > { %v393_v10 = vsel %vm391_vm6, %v392_v9, 0.0 }
 0x31b   : > { %394 = vst [vmem:[%s234_s21] sm:$0x1] %v393_v10 }
 0x31c PF: > { %s15_s18 = sadd.s32 1, %s545_s18  }
 0x31d   : > { %p12_p4 = scmp.ge.s32.totalorder %s15_s18, 6  }
 0x31f   :  { %14 = sbr.rel (!%p12_p4) target bundleno = 1 (0x1), region = 73 }

// kernel: sincere_loss.1
= control target key start
LH: loop header
LB: loop body
LE: loop exit
PB: predicated region body
PF: predicated region fallthrough
CT: control target
= control target key end

     0   :  { %s580_s18 = smov 0   ;;  %s686_s0 = inlined_call_operand.vmem [shape: f32[32,128], index: 0, kind: input, shape index: {}]   ;;  %s687_s1 = inlined_call_operand.vmem [shape: f32[128,32], index: 1, kind: input, shape index: {}]   ;;  %s688_s2 = inlined_call_operand.vmem [shape: s32[32,1], index: 2, kind: input, shape index: {}]   ;;  %s689_s3 = inlined_call_operand.vmem [shape: s32[1,32], index: 3, kind: input, shape index: {}]   ;;  %s690_s4 = inlined_call_operand.vmem [shape: f32[1,32], index: 4, kind: input, shape index: {}]   ;;  %s691_s5 = inlined_call_operand.vmem [shape: f32[1,512], index: 5, kind: output, shape index: {}]  }
   0x1 LB: > { %s586_s19 = sadd.s32 4294967295, %s545_s18   ;;  %p458_p0 = scmp.ge.s32.totalorder %s545_s18, 1  ;;  %s545_s18 = sphi %s580_s18, %s15_s18  }
   0x2   : > { %p195_p1 = scmp.lt.s32.totalorder %s545_s18, 5 }
   0x4   : > { %p196_p2 = pnand %p458_p0, %p195_p1 }
   0x5   : > { %p224_p3 = scmp.lt.s32.totalorder (!%p196_p2), %s586_s19, 3  ;;  %s462_s14 = sshll.u32 (!%p196_p2), %s586_s19, 3 }
   0x6   : > { %199 = sbr.rel (%p196_p2) target bundleno = 796 (0x31c), region = 40 }
   0xb   : > { %v251_v0 = vld [vmem:[%s687_s1 + $0x78] sm:$0xff]  ;;  %v547_v1 = vmov 0.0   ;;  %v250_v2 = vld [vmem:[%s687_s1 + $0x70] sm:$0xff]  ;;  %vm548_vm0 = vmmov 0   ;;  %v249_v3 = vld [vmem:[%s687_s1 + $0x68] sm:$0xff]  ;;  %s636_s17 = scalar_select %p224_p3, %s586_s19, 3  ;;  %v360_v37 = vlaneseq  ;;  %v364_v41 = vstv %s462_s14 }
   0xc   : > { %482 = vmatprep.subr.mxu0 %v547_v1  ;;  %514 = vmatprep.mubr.msk.f32.mxu0 %vm548_vm0, %v547_v1  ;;  %v248_v4 = vld [vmem:[%s687_s1 + $0x60] sm:$0xff]  ;;  %v247_v5 = vld [vmem:[%s687_s1 + $0x58] sm:$0xff]  ;;  %v246_v6 = vld [vmem:[%s687_s1 + $0x50] sm:$0xff]  ;;  %v549_v18 = vmov 0   ;;  %vm335_vm1 = vcmask 261120   ;;  %vm380_vm5 = vcmask 253952  }
   0xd   : > { %483 = vmatpush3.msra.mxu0 %v251_v0  ;;  %v245_v7 = vld [vmem:[%s687_s1 + $0x48] sm:$0xff]  ;;  %v244_v8 = vld [vmem:[%s687_s1 + $0x40] sm:$0xff]  ;;  %v243_v9 = vld [vmem:[%s687_s1 + $0x38] sm:$0xff]  ;;  %s459_s24 = sshll.u32 %s636_s17, 3  ;;  %530 = vset.pattern.permute.xlu0 %v549_v18  ;;  %v361_v40 = vshrl.u32 %v360_v37, 7  ;;  %v363_v43 = vand.u32 127, %v360_v37  ;;  %s234_s21 = scalar_lea.vmem %s691_s5, %s636_s17 }
   0xe   : > { %484 = vmatprep.subr.mxu0 %v547_v1  ;;  %v242_v10 = vld [vmem:[%s687_s1 + $0x30] sm:$0xff]  ;;  %v241_v11 = vld [vmem:[%s687_s1 + $0x28] sm:$0xff]  ;;  %v240_v12 = vld [vmem:[%s687_s1 + $0x20] sm:$0xff]  ;;  %s227_s6 = scalar_lea.vmem %s686_s0, %s459_s24  ;;  %s231_s11 = scalar_lea.vmem %s688_s2, %s459_s24 }
   0xf   : > { %485 = vmatpush3.msra.mxu0 %v250_v2  ;;  %v239_v13 = vld [vmem:[%s687_s1 + $0x18] sm:$0xff]  ;;  %v238_v14 = vld [vmem:[%s687_s1 + $0x10] sm:$0xff]  ;;  %v237_v15 = vld [vmem:[%s687_s1 + $0x8] sm:$0xff]  ;;  %v365_v44 = vadd.s32 %v364_v41, %v361_v40  ;;  %vm391_vm6 = vcmp.eq.s32.totalorder %v363_v43, 0 }
  0x10   : > { %486 = vmatprep.subr.mxu0 %v547_v1  ;;  %v236_v16 = vld [vmem:[%s687_s1] sm:$0xff] }
  0x11   : > { %487 = vmatpush3.msra.mxu0 %v249_v3  ;;  %v235_v17 = vld [vmem:[%s227_s6] sm:$0xff]  ;;  %vm366_vm3 = vcmp.eq.s32.totalorder %v363_v43, %v365_v44 }
  0x12   : > { %488 = vmatprep.subr.mxu0 %v547_v1  ;;  %v323_v23 = vld [vmem:[%s231_s11] sm:$0xff]  ;;  %v367_v47 = vsel %vm366_vm3, 1.0, %v547_v1 }
  0x13   : > { %489 = vmatpush3.msra.mxu0 %v248_v4  ;;  %v461_v27 = vld [vmem:[%s689_s3] ss:$0 sm:$0xff] }
  0x14   : > { %490 = vmatprep.subr.mxu0 %v547_v1  ;;  %v378_v62 = vld [vmem:[%s690_s4] sm:$0x1] }
  0x15   : > { %491 = vmatpush3.msra.mxu0 %v247_v5 }
  0x16   : > { %492 = vmatprep.subr.mxu0 %v547_v1 }
  0x17   : > { %493 = vmatpush3.msra.mxu0 %v246_v6 }
  0x18   : > { %494 = vmatprep.subr.mxu0 %v547_v1 }
  0x19   : > { %495 = vmatpush3.msra.mxu0 %v245_v7 }
  0x1a   : > { %496 = vmatprep.subr.mxu0 %v547_v1 }
  0x1b   : > { %497 = vmatpush3.msra.mxu0 %v244_v8 }
  0x1c   : > { %498 = vmatprep.subr.mxu0 %v547_v1 }
  0x1d   : > { %499 = vmatpush3.msra.mxu0 %v243_v9 }
  0x1e   : > { %500 = vmatprep.subr.mxu0 %v547_v1 }
  0x1f   : > { %501 = vmatpush3.msra.mxu0 %v242_v10 }
  0x20   : > { %502 = vmatprep.subr.mxu0 %v547_v1 }
  0x21   : > { %503 = vmatpush3.msra.mxu0 %v241_v11 }
  0x22   : > { %504 = vmatprep.subr.mxu0 %v547_v1 }
  0x23   : > { %505 = vmatpush3.msra.mxu0 %v240_v12 }
  0x24   : > { %506 = vmatprep.subr.mxu0 %v547_v1 }
  0x25   : > { %507 = vmatpush3.msra.mxu0 %v239_v13 }
  0x26   : > { %508 = vmatprep.subr.mxu0 %v547_v1 }
  0x27   : > { %509 = vmatpush3.msra.mxu0 %v238_v14 }
  0x28   : > { %510 = vmatprep.subr.mxu0 %v547_v1 }
  0x29   : > { %511 = vmatpush3.msra.mxu0 %v237_v15 }
  0x2a   : > { %512 = vmatprep.subr.mxu0 %v547_v1 }
  0x2b   : > { %513 = vmatpush3.msra.mxu0 %v236_v16 }
  0x2c   : > { %515 = vmatmul.mubr.f32.vlgmr.msra.gmra.mxu0 %v235_v17 }
  0xec   : > { %v318_v19 = vpop.f32.mrf.mxu0 }
  0xed   : > { %v322_v20 = vmul.f32 14.285714, %v318_v19 }
  0xee   : > { %v516_v21 = vpop.f32.mrf.mxu0 }
  0xef   : > { %v336_v22 = vsel %vm335_vm1, %v322_v20, -inf }
  0xf0   : > { %337 = vmax.xlane.f32.xlu0 %v336_v22 }
 0x106   : > { %326 = vperm.xlu0 %530, %v323_v23  }
 0x179   : > { %v338_v24 = vpop.xlane.xlu0 %337 }
 0x17a   : > { %v339_v25 = vsub.f32 %v322_v20, %v338_v24 }
 0x17c   : > { %v340_v26 = vmul.f32 1.442695, %v339_v25 }
 0x17e   : > { %531 = vpow2.f32 %v340_v26 }
 0x181   : > { %v327_v28 = vpop.permute.xlu0 %326 }
 0x182   : > { %vm332_vm2 = vcmp.eq.s32.totalorder %v327_v28, %v461_v27 }
 0x183   : > { %v333_v29 = vsel %vm332_vm2, 1.0, %v547_v1 }
 0x184   : > { %v334_v30 = vsub.f32 1.0, %v333_v29  ;;  %v368_v50 = vsub.f32 %v333_v29, %v367_v47 }
 0x18b   : > { %v532_v31 = vpop.eup %531 }
 0x18c   : > { %v342_v32 = vmul.f32 %v532_v31, %v334_v30 }
 0x18e   : > { %v343_v33 = vsel %vm335_vm1, %v342_v32, 0.0 }
 0x18f   : > { %344 = vadd.xlane.f32.xlu1 %v343_v33 }
 0x218   : > { %v345_v34 = vpop.xlane.xlu1 %344 }
 0x219   : > { %v348_v35 = vmax.f32 %v345_v34, 1e-30  ;;  %vm346_vm4 = vcmp.gt.f32.partialorder %v345_v34, 0.0 }
 0x21a   : > { %v347_v49 = vsel %vm346_vm4, 1.0, %v547_v1 }
 0x21b   : > { %533 = vrcp.f32 %v348_v35  ;;  %v369_v54 = vmul.f32 %v368_v50, %v347_v49 }
 0x21c   : > { %535 = vlog2.f32 %v348_v35 }
 0x228   : > { %v534_v36 = vpop.eup %533 }
 0x229   : > { %v353_v38 = vmul.f32 %v534_v36, %v532_v31  ;;  %v536_v42 = vpop.eup %535 }
 0x22a   : > { %v350_v45 = vmul.f32 0.6931472, %v536_v42 }
 0x22b   : > { %v354_v39 = vadd.f32 1.0, %v353_v38 }
 0x22c   : > { %v351_v46 = vadd.f32 %v350_v45, %v338_v24 }
 0x22d   : > { %537 = vlog2.f32 %v354_v39 }
 0x22e   : > { %v357_v52 = vsub.f32 %v351_v46, %v322_v20 }
 0x23a   : > { %v538_v48 = vpop.eup %537 }
 0x23b   : > { %v356_v51 = vmul.f32 0.6931472, %v538_v48 }
 0x23d   : > { %v358_v53 = vadd.f32 %v357_v52, %v356_v51 }
 0x23f   : > { %v370_v55 = vmul.f32 %v369_v54, %v358_v53 }
 0x241   : > { %v371_v56 = vsel %vm335_vm1, %v370_v55, 0.0 }
 0x242   : > { %v372_v57 = vrot.slane %v371_v56, 4 }
 0x244   : > { %v373_v58 = vadd.f32 %v372_v57, %v371_v56 }
 0x246   : > { %v374_v59 = vrot.slane %v373_v58, 2 }
 0x248   : > { %v375_v60 = vadd.f32 %v374_v59, %v373_v58 }
 0x24a   : > { %v376_v61 = vrot.slane %v375_v60, 1 }
 0x24c   : > { %v377_v63 = vadd.f32 %v376_v61, %v375_v60 }
 0x24e   : > { %v379_v0 = vmul.f32 %v378_v62, %v377_v63 }
 0x250   : > { %v381_v1 = vsel %vm380_vm5, %v379_v0, 0.0 }
 0x251   : > { %382 = vadd.xlane.f32.xlu1 %v381_v1 }
 0x2da   : > { %v383_v2 = vpop.xlane.xlu1 %382 }
 0x2db   : > { %v384_v3 = vrot.slane %v383_v2, 4 }
 0x2dd   : > { %v385_v4 = vadd.f32 %v384_v3, %v383_v2 }
 0x2df   : > { %v386_v5 = vrot.slane %v385_v4, 2 }
 0x2e1   : > { %v387_v6 = vadd.f32 %v386_v5, %v385_v4 }
 0x2e3   : > { %v388_v7 = vrot.slane %v387_v6, 1 }
 0x2e5   : > { %v389_v8 = vadd.f32 %v388_v7, %v387_v6 }
 0x2e7   : > { %517 = vpush %v389_v8 }
 0x318   : > { %s518_s22 = spop %517 }
 0x319   : > { %v392_v9 = vstv %s518_s22 }
 0x31a   : > { %v393_v10 = vsel %vm391_vm6, %v392_v9, 0.0 }
 0x31b   : > { %394 = vst [vmem:[%s234_s21] sm:$0x1] %v393_v10 }
 0x31c PF: > { %s15_s18 = sadd.s32 1, %s545_s18  }
 0x31d   : > { %p12_p4 = scmp.ge.s32.totalorder %s15_s18, 6  }
 0x31f   :  { %14 = sbr.rel (!%p12_p4) target bundleno = 1 (0x1), region = 73 }

</bundles_post_ra>
